<compile_context>
chip_gen: v5e
topology: v5e:2x2
jax: 0.10.0
libtpu: 0.0.40
codegen_flags: <defaults>
</compile_context>

<pallas_src>
import functools

import jax
import jax.numpy as jnp
from jax.experimental import pallas as pl
from jax.experimental.pallas import tpu as pltpu


def cdl_cmi_kernel(x_ref, y_ref, p_ref, out_ref, *, n_feat, four_h):
    x = x_ref[...]                    # [B, N]
    y = y_ref[...]                    # [B, K]
    B, N = x.shape
    K = y.shape[1]
    D = n_feat
    two_h = four_h // 2
    h = four_h // 4
    inv_n = 1.0 / N

    # Unpack the single parameter slab (static sub-rectangle loads).
    w1 = p_ref[0:D, 0:four_h]              # [D, 4H]  layer-1 weights [mu|lv|mun|lvn]
    lm = p_ref[D:D + 2, 0:D]               # [2, D]   row0 = linear_map weight, row1 = bias
    b1 = p_ref[D + 2:D + 3, 0:four_h]      # [1, 4H]  layer-1 biases
    w2 = p_ref[D + 3:D + 4, 0:four_h]      # [1, 4H]  layer-2 weights (one row per net half)
    b2 = p_ref[D + 4:D + 5, 0:four_h]      # [1, 4H]  lanes 0..3 = [b2_mu, b2_lv, b2_mun, b2_lvn]

    # Rank-1 structure of the (affine) masked mean -> layer-1 pre-activation:
    #   mean_full[b]   = (sum_x[b]/N)          * lm_w +            lm_b
    #   mean_mask_i[b] = ((sum_x[b]-x[b,i])/N) * lm_w + ((N-1)/N) * lm_b
    #   mean @ W1 + b1 = s * v + c,   v = (lm_w@W1)/N,   c = alpha*(lm_b@W1) + b1
    vu = jnp.dot(lm, w1, preferred_element_type=jnp.float32)   # [2, 4H]  (only MXU op)
    v = vu[0:1, :] * inv_n                                     # [1, 4H]
    u = vu[1:2, :]                                             # [1, 4H]
    c_full = u + b1                                            # [1, 4H]
    c_mask = u * ((N - 1) * inv_n) + b1                        # [1, 4H]

    sum_x = jnp.sum(x, axis=1, keepdims=True)                  # [B, 1]
    s_all = sum_x - x                                          # [B, N]; column i = sum - x[:, i]

    # ---------------- positive path (p_mu / p_logvar: first 2H lanes) ----------------
    v_p, cf_p, cm_p, w2_p = (v[:, :two_h], c_full[:, :two_h],
                             c_mask[:, :two_h], w2[:, :two_h])
    # k == 0 uses the full mean; k >= 1 reuses `max_values` left over from the previous
    # inner loop, i.e. the mean with row (N-2) zeroed (PyTorch quirk).
    s_last = s_all[:, N - 2:N - 1]                             # [B, 1]
    p0 = jnp.maximum(sum_x * v_p + cf_p, 0.0) * w2_p           # [B, 2H]
    p1 = jnp.maximum(s_last * v_p + cm_p, 0.0) * w2_p          # [B, 2H]
    mu0 = jnp.sum(p0[:, :h], axis=1, keepdims=True) + b2[:, 0:1]
    lv0 = jnp.tanh(jnp.sum(p0[:, h:], axis=1, keepdims=True) + b2[:, 1:2])
    mu1 = jnp.sum(p1[:, :h], axis=1, keepdims=True) + b2[:, 0:1]
    lv1 = jnp.tanh(jnp.sum(p1[:, h:], axis=1, keepdims=True) + b2[:, 1:2])

    pos0 = -(mu0 - y) ** 2 * (0.5 * jnp.exp(-lv0)) - 0.5 * lv0   # [B, K]
    pos1 = -(mu1 - y) ** 2 * (0.5 * jnp.exp(-lv1)) - 0.5 * lv1   # [B, K]
    k_idx = jax.lax.broadcasted_iota(jnp.int32, (B, K), 1)
    pos = jnp.where(k_idx == 0, pos0, pos1)                      # [B, K]
    pos_mean = jnp.sum(pos, axis=0, keepdims=True) * (1.0 / B)   # [1, K]

    # ------------- negative path (p_mu_neg / p_logvar_neg: last 2H lanes) -------------
    v_n, c_n, w2_n = v[:, two_h:], c_mask[:, two_h:], w2[:, two_h:]
    b2_mun, b2_lvn = b2[:, 2:3], b2[:, 3:4]
    # sum_i[-(mu_i-y)^2*e_i/2 - lv_i/2] = -0.5*(A - 2*B*y + C*y^2 + L)
    # with A=sum mu^2 e, B=sum mu e, C=sum e, L=sum lv  ->  the k-dependent part
    # is computed once after the loop instead of per iteration.
    acc_a = jnp.zeros((B, 1), jnp.float32)
    acc_b = jnp.zeros((B, 1), jnp.float32)
    acc_c = jnp.zeros((B, 1), jnp.float32)
    acc_l = jnp.zeros((B, 1), jnp.float32)
    for i in range(N - 1):      # trace-time unroll: pure VPU/XLU/EUP, no MXU, no DMA
        s_i = s_all[:, i:i + 1]                                  # [B, 1]
        prod = jnp.maximum(s_i * v_n + c_n, 0.0) * w2_n          # [B, 2H]
        mu_i = jnp.sum(prod[:, :h], axis=1, keepdims=True) + b2_mun
        lv_i = jnp.tanh(jnp.sum(prod[:, h:], axis=1, keepdims=True) + b2_lvn)
        e_i = jnp.exp(-lv_i)
        acc_a = acc_a + mu_i * mu_i * e_i
        acc_b = acc_b + mu_i * e_i
        acc_c = acc_c + e_i
        acc_l = acc_l + lv_i
    neg = -0.5 * (acc_a - 2.0 * acc_b * y + acc_c * (y * y) + acc_l)   # [B, K]
    neg_mean = jnp.sum(neg, axis=0, keepdims=True) * (1.0 / (B * (N - 1)))

    # cmi_dims[k] = | mean_{b,i}(positive[b,k] - negative[b,i,k]) |
    out_ref[...] = jnp.abs(pos_mean - neg_mean)


def pack_params(p):
    """Concatenate the 18 tiny parameter tensors into one [D+5, max(D,4H)] slab."""
    D = p['lm_w'].shape[1]
    hh = p['mu_w1'].shape[1]
    four_h = 4 * hh
    width = max(D, four_h)

    def padw(a):
        return jnp.pad(a, ((0, 0), (0, width - a.shape[1])))

    w1 = jnp.concatenate([p['mu_w1'], p['lv_w1'], p['mun_w1'], p['lvn_w1']], axis=1)      # [D, 4H]
    lm = jnp.concatenate([p['lm_w'], p['lm_b']], axis=0)                                  # [2, D]
    b1 = jnp.concatenate([p['mu_b1'], p['lv_b1'], p['mun_b1'], p['lvn_b1']], axis=1)      # [1, 4H]
    w2 = jnp.concatenate([p['mu_w2'].T, p['lv_w2'].T, p['mun_w2'].T, p['lvn_w2'].T], axis=1)  # [1, 4H]
    b2 = jnp.concatenate([p['mu_b2'], p['lv_b2'], p['mun_b2'], p['lvn_b2']], axis=1)      # [1, 4]
    b2 = jnp.pad(b2, ((0, 0), (0, four_h - 4)))                                           # [1, 4H]
    slab = jnp.concatenate([padw(w1), padw(lm), padw(b1), padw(w2), padw(b2)], axis=0)    # [D+5, W]
    return {'slab': slab, 'n_feat': D, 'four_h': four_h}


def cdl_cmi_forward(x, y, packed):
    """Pallas implementation of CDL_CMI.forward. Returns float32 [K]."""
    B, N = x.shape
    K = y.shape[1]
    assert N >= 2 and K >= 1, "kernel assumes N >= 2 and K >= 1"
    kernel = functools.partial(cdl_cmi_kernel,
                               n_feat=packed['n_feat'], four_h=packed['four_h'])
    # Single grid point; everything fits in a few KiB of VMEM, so no tiling /
    # pipelining is needed.  (For many independent problems, add a leading
    # "parallel" grid axis so v7x can use both TensorCores.)
    out = pl.pallas_call(
        kernel,
        out_shape=jax.ShapeDtypeStruct((1, K), jnp.float32),
        in_specs=[pl.BlockSpec(memory_space=pltpu.MemorySpace.VMEM)] * 3,
        out_specs=pl.BlockSpec(memory_space=pltpu.MemorySpace.VMEM),
    )(x, y, packed['slab'])
    return out[0]


def init_params(key, x_dim, hidden_size):
    """Deterministic PyTorch-style (uniform +/- 1/sqrt(fan_in)) initialization."""
    h2 = hidden_size // 2
    keys = jax.random.split(key, 20)

    def lin(kw, kb, fan_in, fan_out):
        bound = 1.0 / float(fan_in) ** 0.5
        w = jax.random.uniform(kw, (fan_in, fan_out), jnp.float32, -bound, bound)
        b = jax.random.uniform(kb, (1, fan_out), jnp.float32, -bound, bound)
        return w, b

    p = {}
    p['lm_w'], p['lm_b'] = lin(keys[0], keys[1], 1, x_dim)           # Linear(1, x_dim)
    p['mu_w1'], p['mu_b1'] = lin(keys[2], keys[3], x_dim, h2)
    p['mu_w2'], p['mu_b2'] = lin(keys[4], keys[5], h2, 1)
    p['lv_w1'], p['lv_b1'] = lin(keys[6], keys[7], x_dim, h2)
    p['lv_w2'], p['lv_b2'] = lin(keys[8], keys[9], h2, 1)
    p['mun_w1'], p['mun_b1'] = lin(keys[10], keys[11], x_dim, h2)
    p['mun_w2'], p['mun_b2'] = lin(keys[12], keys[13], h2, 1)
    p['lvn_w1'], p['lvn_b1'] = lin(keys[14], keys[15], x_dim, h2)
    p['lvn_w2'], p['lvn_b2'] = lin(keys[16], keys[17], h2, 1)
    # p_score (Linear(x_dim-1, 1)) is defined in __init__ but unused in forward.
    return p


def reference_forward(x, y, p):
    """Literal JAX translation of the PyTorch forward (for verification)."""
    B, N = x.shape
    K = y.shape[1]
    xm = x[:, :, None] * p['lm_w'][0][None, None, :] + p['lm_b'][0][None, None, :]

    def mlp(z, w1, b1, w2, b2):
        return jnp.maximum(z @ w1 + b1, 0.0) @ w2 + b2

    mv = jnp.mean(xm, axis=1)
    cmis = []
    for k in range(K):
        mu = mlp(mv, p['mu_w1'], p['mu_b1'], p['mu_w2'], p['mu_b2'])
        lv = jnp.tanh(mlp(mv, p['lv_w1'], p['lv_b1'], p['lv_w2'], p['lv_b2']))
        pos = (-(mu - y[:, k:k + 1]) ** 2 / 2.0 / jnp.exp(lv) - lv / 2.0).sum(-1)
        negs = []
        for i in range(N - 1):
            xn = xm.at[:, i, :].set(0.0)
            mv = jnp.mean(xn, axis=1)      # intentionally leaks out of the loop
            mun = mlp(mv, p['mun_w1'], p['mun_b1'], p['mun_w2'], p['mun_b2'])
            lvn = jnp.tanh(mlp(mv, p['lvn_w1'], p['lvn_b1'], p['lvn_w2'], p['lvn_b2']))
            negs.append((-(mun - y[:, k:k + 1]) ** 2 / 2.0 / jnp.exp(lvn) - lvn / 2.0).sum(-1))
        negative = jnp.stack(negs, axis=1)
        cmis.append(jnp.abs(jnp.mean(pos[:, None] - negative)))
    return jnp.stack(cmis)


if __name__ == "__main__":
    x_dim = 8        # feature dim == number of "items" (matches p_score = Linear(x_dim-1, 1))
    hidden = 32
    B = 4
    K = 3            # y_samples.shape[1]

    key = jax.random.PRNGKey(0)
    kx, ky, kp = jax.random.split(key, 3)
    x = jax.random.normal(kx, (B, x_dim), jnp.float32)
    y = jax.random.normal(ky, (B, K), jnp.float32)
    params = init_params(kp, x_dim, hidden)
    packed = pack_params(params)

    out = jax.block_until_ready(cdl_cmi_forward(x, y, packed))
    ref = reference_forward(x, y, params)
    assert out.shape == (K,)
    assert jnp.allclose(out, ref, rtol=1e-4, atol=1e-4), (out, ref)
    print("KERNEL_OK")
</pallas_src>

<mosaic_0001>
module attributes {stable_mosaic.version = 11 : i64} {
  func.func @cdl_cmi_kernel(%arg0: memref<4x8xf32, #tpu.memory_space<vmem>>, %arg1: memref<4x3xf32, #tpu.memory_space<vmem>>, %arg2: memref<13x64xf32, #tpu.memory_space<vmem>>, %arg3: memref<1x3xf32, #tpu.memory_space<vmem>>) attributes {dimension_semantics = [], scalar_prefetch = 0 : i64, scratch_operands = 0 : i64, tpu.core_type = #tpu.core_type<tc>} {
    %c0 = arith.constant 0 : index
    %c0_0 = arith.constant 0 : index
    %0 = vector.load %arg0[%c0, %c0_0] : memref<4x8xf32, #tpu.memory_space<vmem>>, vector<4x8xf32>
    %c0_1 = arith.constant 0 : index
    %c0_2 = arith.constant 0 : index
    %1 = vector.load %arg1[%c0_1, %c0_2] : memref<4x3xf32, #tpu.memory_space<vmem>>, vector<4x3xf32>
    %c0_3 = arith.constant 0 : index
    %c0_4 = arith.constant 0 : index
    %2 = vector.load %arg2[%c0_3, %c0_4] : memref<13x64xf32, #tpu.memory_space<vmem>>, vector<8x64xf32>
    %c8 = arith.constant 8 : index
    %c0_5 = arith.constant 0 : index
    %3 = vector.load %arg2[%c8, %c0_5] : memref<13x64xf32, #tpu.memory_space<vmem>>, vector<2x8xf32>
    %c10 = arith.constant 10 : index
    %c0_6 = arith.constant 0 : index
    %4 = vector.load %arg2[%c10, %c0_6] : memref<13x64xf32, #tpu.memory_space<vmem>>, vector<1x64xf32>
    %c11 = arith.constant 11 : index
    %c0_7 = arith.constant 0 : index
    %5 = vector.load %arg2[%c11, %c0_7] : memref<13x64xf32, #tpu.memory_space<vmem>>, vector<1x64xf32>
    %c12 = arith.constant 12 : index
    %c0_8 = arith.constant 0 : index
    %6 = vector.load %arg2[%c12, %c0_8] : memref<13x64xf32, #tpu.memory_space<vmem>>, vector<1x64xf32>
    %cst = arith.constant dense<0.000000e+00> : vector<2x64xf32>
    %7 = tpu.matmul %3, %2, %cst {dimension_numbers = #tpu.dot_dimension_numbers<[1], [0], [0], [1], [0, 0, 1, 1], [], []>} : vector<2x8xf32>, vector<8x64xf32>, vector<2x64xf32> -> vector<2x64xf32>
    %8 = vector.extract_strided_slice %7 {offsets = [0, 0], sizes = [1, 64], strides = [1, 1]} : vector<2x64xf32> to vector<1x64xf32>
    %cst_9 = arith.constant 1.250000e-01 : f32
    %9 = vector.broadcast %cst_9 : f32 to vector<1x64xf32>
    %10 = arith.mulf %8, %9 : vector<1x64xf32>
    %11 = vector.extract_strided_slice %7 {offsets = [1, 0], sizes = [1, 64], strides = [1, 1]} : vector<2x64xf32> to vector<1x64xf32>
    %12 = arith.addf %11, %4 : vector<1x64xf32>
    %cst_10 = arith.constant 8.750000e-01 : f32
    %13 = vector.broadcast %cst_10 : f32 to vector<1x64xf32>
    %14 = arith.mulf %11, %13 : vector<1x64xf32>
    %15 = arith.addf %14, %4 : vector<1x64xf32>
    %cst_11 = arith.constant dense<0.000000e+00> : vector<4xf32>
    %16 = vector.multi_reduction <add>, %0, %cst_11 [1] : vector<4x8xf32> to vector<4xf32>
    %17 = vector.shape_cast %16 : vector<4xf32> to vector<4x1xf32>
    %18 = vector.broadcast %17 : vector<4x1xf32> to vector<4x8xf32>
    %19 = arith.subf %18, %0 : vector<4x8xf32>
    %20 = vector.extract_strided_slice %10 {offsets = [0, 0], sizes = [1, 32], strides = [1, 1]} : vector<1x64xf32> to vector<1x32xf32>
    %21 = vector.extract_strided_slice %12 {offsets = [0, 0], sizes = [1, 32], strides = [1, 1]} : vector<1x64xf32> to vector<1x32xf32>
    %22 = vector.extract_strided_slice %15 {offsets = [0, 0], sizes = [1, 32], strides = [1, 1]} : vector<1x64xf32> to vector<1x32xf32>
    %23 = vector.extract_strided_slice %5 {offsets = [0, 0], sizes = [1, 32], strides = [1, 1]} : vector<1x64xf32> to vector<1x32xf32>
    %24 = vector.extract_strided_slice %19 {offsets = [0, 6], sizes = [4, 1], strides = [1, 1]} : vector<4x8xf32> to vector<4x1xf32>
    %25 = vector.broadcast %17 : vector<4x1xf32> to vector<4x32xf32>
    %26 = vector.broadcast %20 : vector<1x32xf32> to vector<4x32xf32>
    %27 = arith.mulf %25, %26 : vector<4x32xf32>
    %28 = vector.broadcast %21 : vector<1x32xf32> to vector<4x32xf32>
    %29 = arith.addf %27, %28 : vector<4x32xf32>
    %cst_12 = arith.constant 0.000000e+00 : f32
    %30 = vector.broadcast %cst_12 : f32 to vector<4x32xf32>
    %31 = arith.maximumf %29, %30 : vector<4x32xf32>
    %32 = vector.broadcast %23 : vector<1x32xf32> to vector<4x32xf32>
    %33 = arith.mulf %31, %32 : vector<4x32xf32>
    %34 = vector.broadcast %24 : vector<4x1xf32> to vector<4x32xf32>
    %35 = vector.broadcast %20 : vector<1x32xf32> to vector<4x32xf32>
    %36 = arith.mulf %34, %35 : vector<4x32xf32>
    %37 = vector.broadcast %22 : vector<1x32xf32> to vector<4x32xf32>
    %38 = arith.addf %36, %37 : vector<4x32xf32>
    %cst_13 = arith.constant 0.000000e+00 : f32
    %39 = vector.broadcast %cst_13 : f32 to vector<4x32xf32>
    %40 = arith.maximumf %38, %39 : vector<4x32xf32>
    %41 = vector.broadcast %23 : vector<1x32xf32> to vector<4x32xf32>
    %42 = arith.mulf %40, %41 : vector<4x32xf32>
    %43 = vector.extract_strided_slice %33 {offsets = [0, 0], sizes = [4, 16], strides = [1, 1]} : vector<4x32xf32> to vector<4x16xf32>
    %cst_14 = arith.constant dense<0.000000e+00> : vector<4xf32>
    %44 = vector.multi_reduction <add>, %43, %cst_14 [1] : vector<4x16xf32> to vector<4xf32>
    %45 = vector.shape_cast %44 : vector<4xf32> to vector<4x1xf32>
    %46 = vector.extract_strided_slice %6 {offsets = [0, 0], sizes = [1, 1], strides = [1, 1]} : vector<1x64xf32> to vector<1x1xf32>
    %47 = vector.broadcast %46 : vector<1x1xf32> to vector<4x1xf32>
    %48 = arith.addf %45, %47 : vector<4x1xf32>
    %49 = vector.extract_strided_slice %33 {offsets = [0, 16], sizes = [4, 16], strides = [1, 1]} : vector<4x32xf32> to vector<4x16xf32>
    %cst_15 = arith.constant dense<0.000000e+00> : vector<4xf32>
    %50 = vector.multi_reduction <add>, %49, %cst_15 [1] : vector<4x16xf32> to vector<4xf32>
    %51 = vector.shape_cast %50 : vector<4xf32> to vector<4x1xf32>
    %52 = vector.extract_strided_slice %6 {offsets = [0, 1], sizes = [1, 1], strides = [1, 1]} : vector<1x64xf32> to vector<1x1xf32>
    %53 = vector.broadcast %52 : vector<1x1xf32> to vector<4x1xf32>
    %54 = arith.addf %51, %53 : vector<4x1xf32>
    %55 = math.tanh %54 : vector<4x1xf32>
    %56 = vector.extract_strided_slice %42 {offsets = [0, 0], sizes = [4, 16], strides = [1, 1]} : vector<4x32xf32> to vector<4x16xf32>
    %cst_16 = arith.constant dense<0.000000e+00> : vector<4xf32>
    %57 = vector.multi_reduction <add>, %56, %cst_16 [1] : vector<4x16xf32> to vector<4xf32>
    %58 = vector.shape_cast %57 : vector<4xf32> to vector<4x1xf32>
    %59 = vector.extract_strided_slice %6 {offsets = [0, 0], sizes = [1, 1], strides = [1, 1]} : vector<1x64xf32> to vector<1x1xf32>
    %60 = vector.broadcast %59 : vector<1x1xf32> to vector<4x1xf32>
    %61 = arith.addf %58, %60 : vector<4x1xf32>
    %62 = vector.extract_strided_slice %42 {offsets = [0, 16], sizes = [4, 16], strides = [1, 1]} : vector<4x32xf32> to vector<4x16xf32>
    %cst_17 = arith.constant dense<0.000000e+00> : vector<4xf32>
    %63 = vector.multi_reduction <add>, %62, %cst_17 [1] : vector<4x16xf32> to vector<4xf32>
    %64 = vector.shape_cast %63 : vector<4xf32> to vector<4x1xf32>
    %65 = vector.extract_strided_slice %6 {offsets = [0, 1], sizes = [1, 1], strides = [1, 1]} : vector<1x64xf32> to vector<1x1xf32>
    %66 = vector.broadcast %65 : vector<1x1xf32> to vector<4x1xf32>
    %67 = arith.addf %64, %66 : vector<4x1xf32>
    %68 = math.tanh %67 : vector<4x1xf32>
    %69 = vector.broadcast %48 : vector<4x1xf32> to vector<4x3xf32>
    %70 = arith.subf %69, %1 : vector<4x3xf32>
    %71 = arith.mulf %70, %70 : vector<4x3xf32>
    %cst_18 = arith.constant 0.000000e+00 : f32
    %72 = vector.broadcast %cst_18 : f32 to vector<4x3xf32>
    %73 = arith.subf %72, %71 : vector<4x3xf32>
    %cst_19 = arith.constant 0.000000e+00 : f32
    %74 = vector.broadcast %cst_19 : f32 to vector<4x1xf32>
    %75 = arith.subf %74, %55 : vector<4x1xf32>
    %76 = math.exp %75 : vector<4x1xf32>
    %cst_20 = arith.constant 5.000000e-01 : f32
    %77 = vector.broadcast %cst_20 : f32 to vector<4x1xf32>
    %78 = arith.mulf %77, %76 : vector<4x1xf32>
    %79 = vector.broadcast %78 : vector<4x1xf32> to vector<4x3xf32>
    %80 = arith.mulf %73, %79 : vector<4x3xf32>
    %cst_21 = arith.constant 5.000000e-01 : f32
    %81 = vector.broadcast %cst_21 : f32 to vector<4x1xf32>
    %82 = arith.mulf %81, %55 : vector<4x1xf32>
    %83 = vector.broadcast %82 : vector<4x1xf32> to vector<4x3xf32>
    %84 = arith.subf %80, %83 : vector<4x3xf32>
    %85 = vector.broadcast %61 : vector<4x1xf32> to vector<4x3xf32>
    %86 = arith.subf %85, %1 : vector<4x3xf32>
    %87 = arith.mulf %86, %86 : vector<4x3xf32>
    %cst_22 = arith.constant 0.000000e+00 : f32
    %88 = vector.broadcast %cst_22 : f32 to vector<4x3xf32>
    %89 = arith.subf %88, %87 : vector<4x3xf32>
    %cst_23 = arith.constant 0.000000e+00 : f32
    %90 = vector.broadcast %cst_23 : f32 to vector<4x1xf32>
    %91 = arith.subf %90, %68 : vector<4x1xf32>
    %92 = math.exp %91 : vector<4x1xf32>
    %cst_24 = arith.constant 5.000000e-01 : f32
    %93 = vector.broadcast %cst_24 : f32 to vector<4x1xf32>
    %94 = arith.mulf %93, %92 : vector<4x1xf32>
    %95 = vector.broadcast %94 : vector<4x1xf32> to vector<4x3xf32>
    %96 = arith.mulf %89, %95 : vector<4x3xf32>
    %cst_25 = arith.constant 5.000000e-01 : f32
    %97 = vector.broadcast %cst_25 : f32 to vector<4x1xf32>
    %98 = arith.mulf %97, %68 : vector<4x1xf32>
    %99 = vector.broadcast %98 : vector<4x1xf32> to vector<4x3xf32>
    %100 = arith.subf %96, %99 : vector<4x3xf32>
    %101 = tpu.iota {dimensions = array<i32: 1>} : vector<4x3xi32>
    %c0_i32 = arith.constant 0 : i32
    %102 = vector.broadcast %c0_i32 : i32 to vector<4x3xi32>
    %103 = arith.cmpi eq, %101, %102 : vector<4x3xi32>
    %104 = arith.select %103, %84, %100 : vector<4x3xi1>, vector<4x3xf32>
    %cst_26 = arith.constant dense<0.000000e+00> : vector<3xf32>
    %105 = vector.multi_reduction <add>, %104, %cst_26 [0] : vector<4x3xf32> to vector<3xf32>
    %106 = vector.shape_cast %105 : vector<3xf32> to vector<1x3xf32>
    %cst_27 = arith.constant 2.500000e-01 : f32
    %107 = vector.broadcast %cst_27 : f32 to vector<1x3xf32>
    %108 = arith.mulf %106, %107 : vector<1x3xf32>
    %109 = vector.extract_strided_slice %10 {offsets = [0, 32], sizes = [1, 32], strides = [1, 1]} : vector<1x64xf32> to vector<1x32xf32>
    %110 = vector.extract_strided_slice %15 {offsets = [0, 32], sizes = [1, 32], strides = [1, 1]} : vector<1x64xf32> to vector<1x32xf32>
    %111 = vector.extract_strided_slice %5 {offsets = [0, 32], sizes = [1, 32], strides = [1, 1]} : vector<1x64xf32> to vector<1x32xf32>
    %112 = vector.extract_strided_slice %6 {offsets = [0, 2], sizes = [1, 1], strides = [1, 1]} : vector<1x64xf32> to vector<1x1xf32>
    %113 = vector.extract_strided_slice %6 {offsets = [0, 3], sizes = [1, 1], strides = [1, 1]} : vector<1x64xf32> to vector<1x1xf32>
    %cst_28 = arith.constant 0.000000e+00 : f32
    %114 = vector.broadcast %cst_28 : f32 to vector<4x1xf32>
    %cst_29 = arith.constant 0.000000e+00 : f32
    %115 = vector.broadcast %cst_29 : f32 to vector<4x1xf32>
    %cst_30 = arith.constant 0.000000e+00 : f32
    %116 = vector.broadcast %cst_30 : f32 to vector<4x1xf32>
    %cst_31 = arith.constant 0.000000e+00 : f32
    %117 = vector.broadcast %cst_31 : f32 to vector<4x1xf32>
    %118 = vector.extract_strided_slice %19 {offsets = [0, 0], sizes = [4, 1], strides = [1, 1]} : vector<4x8xf32> to vector<4x1xf32>
    %119 = vector.broadcast %118 : vector<4x1xf32> to vector<4x32xf32>
    %120 = vector.broadcast %109 : vector<1x32xf32> to vector<4x32xf32>
    %121 = arith.mulf %119, %120 : vector<4x32xf32>
    %122 = vector.broadcast %110 : vector<1x32xf32> to vector<4x32xf32>
    %123 = arith.addf %121, %122 : vector<4x32xf32>
    %cst_32 = arith.constant 0.000000e+00 : f32
    %124 = vector.broadcast %cst_32 : f32 to vector<4x32xf32>
    %125 = arith.maximumf %123, %124 : vector<4x32xf32>
    %126 = vector.broadcast %111 : vector<1x32xf32> to vector<4x32xf32>
    %127 = arith.mulf %125, %126 : vector<4x32xf32>
    %128 = vector.extract_strided_slice %127 {offsets = [0, 0], sizes = [4, 16], strides = [1, 1]} : vector<4x32xf32> to vector<4x16xf32>
    %cst_33 = arith.constant dense<0.000000e+00> : vector<4xf32>
    %129 = vector.multi_reduction <add>, %128, %cst_33 [1] : vector<4x16xf32> to vector<4xf32>
    %130 = vector.shape_cast %129 : vector<4xf32> to vector<4x1xf32>
    %131 = vector.broadcast %112 : vector<1x1xf32> to vector<4x1xf32>
    %132 = arith.addf %130, %131 : vector<4x1xf32>
    %133 = vector.extract_strided_slice %127 {offsets = [0, 16], sizes = [4, 16], strides = [1, 1]} : vector<4x32xf32> to vector<4x16xf32>
    %cst_34 = arith.constant dense<0.000000e+00> : vector<4xf32>
    %134 = vector.multi_reduction <add>, %133, %cst_34 [1] : vector<4x16xf32> to vector<4xf32>
    %135 = vector.shape_cast %134 : vector<4xf32> to vector<4x1xf32>
    %136 = vector.broadcast %113 : vector<1x1xf32> to vector<4x1xf32>
    %137 = arith.addf %135, %136 : vector<4x1xf32>
    %138 = math.tanh %137 : vector<4x1xf32>
    %cst_35 = arith.constant 0.000000e+00 : f32
    %139 = vector.broadcast %cst_35 : f32 to vector<4x1xf32>
    %140 = arith.subf %139, %138 : vector<4x1xf32>
    %141 = math.exp %140 : vector<4x1xf32>
    %142 = arith.mulf %132, %132 : vector<4x1xf32>
    %143 = arith.mulf %142, %141 : vector<4x1xf32>
    %144 = arith.addf %114, %143 : vector<4x1xf32>
    %145 = arith.mulf %132, %141 : vector<4x1xf32>
    %146 = arith.addf %115, %145 : vector<4x1xf32>
    %147 = arith.addf %116, %141 : vector<4x1xf32>
    %148 = arith.addf %117, %138 : vector<4x1xf32>
    %149 = vector.extract_strided_slice %19 {offsets = [0, 1], sizes = [4, 1], strides = [1, 1]} : vector<4x8xf32> to vector<4x1xf32>
    %150 = vector.broadcast %149 : vector<4x1xf32> to vector<4x32xf32>
    %151 = vector.broadcast %109 : vector<1x32xf32> to vector<4x32xf32>
    %152 = arith.mulf %150, %151 : vector<4x32xf32>
    %153 = vector.broadcast %110 : vector<1x32xf32> to vector<4x32xf32>
    %154 = arith.addf %152, %153 : vector<4x32xf32>
    %cst_36 = arith.constant 0.000000e+00 : f32
    %155 = vector.broadcast %cst_36 : f32 to vector<4x32xf32>
    %156 = arith.maximumf %154, %155 : vector<4x32xf32>
    %157 = vector.broadcast %111 : vector<1x32xf32> to vector<4x32xf32>
    %158 = arith.mulf %156, %157 : vector<4x32xf32>
    %159 = vector.extract_strided_slice %158 {offsets = [0, 0], sizes = [4, 16], strides = [1, 1]} : vector<4x32xf32> to vector<4x16xf32>
    %cst_37 = arith.constant dense<0.000000e+00> : vector<4xf32>
    %160 = vector.multi_reduction <add>, %159, %cst_37 [1] : vector<4x16xf32> to vector<4xf32>
    %161 = vector.shape_cast %160 : vector<4xf32> to vector<4x1xf32>
    %162 = vector.broadcast %112 : vector<1x1xf32> to vector<4x1xf32>
    %163 = arith.addf %161, %162 : vector<4x1xf32>
    %164 = vector.extract_strided_slice %158 {offsets = [0, 16], sizes = [4, 16], strides = [1, 1]} : vector<4x32xf32> to vector<4x16xf32>
    %cst_38 = arith.constant dense<0.000000e+00> : vector<4xf32>
    %165 = vector.multi_reduction <add>, %164, %cst_38 [1] : vector<4x16xf32> to vector<4xf32>
    %166 = vector.shape_cast %165 : vector<4xf32> to vector<4x1xf32>
    %167 = vector.broadcast %113 : vector<1x1xf32> to vector<4x1xf32>
    %168 = arith.addf %166, %167 : vector<4x1xf32>
    %169 = math.tanh %168 : vector<4x1xf32>
    %cst_39 = arith.constant 0.000000e+00 : f32
    %170 = vector.broadcast %cst_39 : f32 to vector<4x1xf32>
    %171 = arith.subf %170, %169 : vector<4x1xf32>
    %172 = math.exp %171 : vector<4x1xf32>
    %173 = arith.mulf %163, %163 : vector<4x1xf32>
    %174 = arith.mulf %173, %172 : vector<4x1xf32>
    %175 = arith.addf %144, %174 : vector<4x1xf32>
    %176 = arith.mulf %163, %172 : vector<4x1xf32>
    %177 = arith.addf %146, %176 : vector<4x1xf32>
    %178 = arith.addf %147, %172 : vector<4x1xf32>
    %179 = arith.addf %148, %169 : vector<4x1xf32>
    %180 = vector.extract_strided_slice %19 {offsets = [0, 2], sizes = [4, 1], strides = [1, 1]} : vector<4x8xf32> to vector<4x1xf32>
    %181 = vector.broadcast %180 : vector<4x1xf32> to vector<4x32xf32>
    %182 = vector.broadcast %109 : vector<1x32xf32> to vector<4x32xf32>
    %183 = arith.mulf %181, %182 : vector<4x32xf32>
    %184 = vector.broadcast %110 : vector<1x32xf32> to vector<4x32xf32>
    %185 = arith.addf %183, %184 : vector<4x32xf32>
    %cst_40 = arith.constant 0.000000e+00 : f32
    %186 = vector.broadcast %cst_40 : f32 to vector<4x32xf32>
    %187 = arith.maximumf %185, %186 : vector<4x32xf32>
    %188 = vector.broadcast %111 : vector<1x32xf32> to vector<4x32xf32>
    %189 = arith.mulf %187, %188 : vector<4x32xf32>
    %190 = vector.extract_strided_slice %189 {offsets = [0, 0], sizes = [4, 16], strides = [1, 1]} : vector<4x32xf32> to vector<4x16xf32>
    %cst_41 = arith.constant dense<0.000000e+00> : vector<4xf32>
    %191 = vector.multi_reduction <add>, %190, %cst_41 [1] : vector<4x16xf32> to vector<4xf32>
    %192 = vector.shape_cast %191 : vector<4xf32> to vector<4x1xf32>
    %193 = vector.broadcast %112 : vector<1x1xf32> to vector<4x1xf32>
    %194 = arith.addf %192, %193 : vector<4x1xf32>
    %195 = vector.extract_strided_slice %189 {offsets = [0, 16], sizes = [4, 16], strides = [1, 1]} : vector<4x32xf32> to vector<4x16xf32>
    %cst_42 = arith.constant dense<0.000000e+00> : vector<4xf32>
    %196 = vector.multi_reduction <add>, %195, %cst_42 [1] : vector<4x16xf32> to vector<4xf32>
    %197 = vector.shape_cast %196 : vector<4xf32> to vector<4x1xf32>
    %198 = vector.broadcast %113 : vector<1x1xf32> to vector<4x1xf32>
    %199 = arith.addf %197, %198 : vector<4x1xf32>
    %200 = math.tanh %199 : vector<4x1xf32>
    %cst_43 = arith.constant 0.000000e+00 : f32
    %201 = vector.broadcast %cst_43 : f32 to vector<4x1xf32>
    %202 = arith.subf %201, %200 : vector<4x1xf32>
    %203 = math.exp %202 : vector<4x1xf32>
    %204 = arith.mulf %194, %194 : vector<4x1xf32>
    %205 = arith.mulf %204, %203 : vector<4x1xf32>
    %206 = arith.addf %175, %205 : vector<4x1xf32>
    %207 = arith.mulf %194, %203 : vector<4x1xf32>
    %208 = arith.addf %177, %207 : vector<4x1xf32>
    %209 = arith.addf %178, %203 : vector<4x1xf32>
    %210 = arith.addf %179, %200 : vector<4x1xf32>
    %211 = vector.extract_strided_slice %19 {offsets = [0, 3], sizes = [4, 1], strides = [1, 1]} : vector<4x8xf32> to vector<4x1xf32>
    %212 = vector.broadcast %211 : vector<4x1xf32> to vector<4x32xf32>
    %213 = vector.broadcast %109 : vector<1x32xf32> to vector<4x32xf32>
    %214 = arith.mulf %212, %213 : vector<4x32xf32>
    %215 = vector.broadcast %110 : vector<1x32xf32> to vector<4x32xf32>
    %216 = arith.addf %214, %215 : vector<4x32xf32>
    %cst_44 = arith.constant 0.000000e+00 : f32
    %217 = vector.broadcast %cst_44 : f32 to vector<4x32xf32>
    %218 = arith.maximumf %216, %217 : vector<4x32xf32>
    %219 = vector.broadcast %111 : vector<1x32xf32> to vector<4x32xf32>
    %220 = arith.mulf %218, %219 : vector<4x32xf32>
    %221 = vector.extract_strided_slice %220 {offsets = [0, 0], sizes = [4, 16], strides = [1, 1]} : vector<4x32xf32> to vector<4x16xf32>
    %cst_45 = arith.constant dense<0.000000e+00> : vector<4xf32>
    %222 = vector.multi_reduction <add>, %221, %cst_45 [1] : vector<4x16xf32> to vector<4xf32>
    %223 = vector.shape_cast %222 : vector<4xf32> to vector<4x1xf32>
    %224 = vector.broadcast %112 : vector<1x1xf32> to vector<4x1xf32>
    %225 = arith.addf %223, %224 : vector<4x1xf32>
    %226 = vector.extract_strided_slice %220 {offsets = [0, 16], sizes = [4, 16], strides = [1, 1]} : vector<4x32xf32> to vector<4x16xf32>
    %cst_46 = arith.constant dense<0.000000e+00> : vector<4xf32>
    %227 = vector.multi_reduction <add>, %226, %cst_46 [1] : vector<4x16xf32> to vector<4xf32>
    %228 = vector.shape_cast %227 : vector<4xf32> to vector<4x1xf32>
    %229 = vector.broadcast %113 : vector<1x1xf32> to vector<4x1xf32>
    %230 = arith.addf %228, %229 : vector<4x1xf32>
    %231 = math.tanh %230 : vector<4x1xf32>
    %cst_47 = arith.constant 0.000000e+00 : f32
    %232 = vector.broadcast %cst_47 : f32 to vector<4x1xf32>
    %233 = arith.subf %232, %231 : vector<4x1xf32>
    %234 = math.exp %233 : vector<4x1xf32>
    %235 = arith.mulf %225, %225 : vector<4x1xf32>
    %236 = arith.mulf %235, %234 : vector<4x1xf32>
    %237 = arith.addf %206, %236 : vector<4x1xf32>
    %238 = arith.mulf %225, %234 : vector<4x1xf32>
    %239 = arith.addf %208, %238 : vector<4x1xf32>
    %240 = arith.addf %209, %234 : vector<4x1xf32>
    %241 = arith.addf %210, %231 : vector<4x1xf32>
    %242 = vector.extract_strided_slice %19 {offsets = [0, 4], sizes = [4, 1], strides = [1, 1]} : vector<4x8xf32> to vector<4x1xf32>
    %243 = vector.broadcast %242 : vector<4x1xf32> to vector<4x32xf32>
    %244 = vector.broadcast %109 : vector<1x32xf32> to vector<4x32xf32>
    %245 = arith.mulf %243, %244 : vector<4x32xf32>
    %246 = vector.broadcast %110 : vector<1x32xf32> to vector<4x32xf32>
    %247 = arith.addf %245, %246 : vector<4x32xf32>
    %cst_48 = arith.constant 0.000000e+00 : f32
    %248 = vector.broadcast %cst_48 : f32 to vector<4x32xf32>
    %249 = arith.maximumf %247, %248 : vector<4x32xf32>
    %250 = vector.broadcast %111 : vector<1x32xf32> to vector<4x32xf32>
    %251 = arith.mulf %249, %250 : vector<4x32xf32>
    %252 = vector.extract_strided_slice %251 {offsets = [0, 0], sizes = [4, 16], strides = [1, 1]} : vector<4x32xf32> to vector<4x16xf32>
    %cst_49 = arith.constant dense<0.000000e+00> : vector<4xf32>
    %253 = vector.multi_reduction <add>, %252, %cst_49 [1] : vector<4x16xf32> to vector<4xf32>
    %254 = vector.shape_cast %253 : vector<4xf32> to vector<4x1xf32>
    %255 = vector.broadcast %112 : vector<1x1xf32> to vector<4x1xf32>
    %256 = arith.addf %254, %255 : vector<4x1xf32>
    %257 = vector.extract_strided_slice %251 {offsets = [0, 16], sizes = [4, 16], strides = [1, 1]} : vector<4x32xf32> to vector<4x16xf32>
    %cst_50 = arith.constant dense<0.000000e+00> : vector<4xf32>
    %258 = vector.multi_reduction <add>, %257, %cst_50 [1] : vector<4x16xf32> to vector<4xf32>
    %259 = vector.shape_cast %258 : vector<4xf32> to vector<4x1xf32>
    %260 = vector.broadcast %113 : vector<1x1xf32> to vector<4x1xf32>
    %261 = arith.addf %259, %260 : vector<4x1xf32>
    %262 = math.tanh %261 : vector<4x1xf32>
    %cst_51 = arith.constant 0.000000e+00 : f32
    %263 = vector.broadcast %cst_51 : f32 to vector<4x1xf32>
    %264 = arith.subf %263, %262 : vector<4x1xf32>
    %265 = math.exp %264 : vector<4x1xf32>
    %266 = arith.mulf %256, %256 : vector<4x1xf32>
    %267 = arith.mulf %266, %265 : vector<4x1xf32>
    %268 = arith.addf %237, %267 : vector<4x1xf32>
    %269 = arith.mulf %256, %265 : vector<4x1xf32>
    %270 = arith.addf %239, %269 : vector<4x1xf32>
    %271 = arith.addf %240, %265 : vector<4x1xf32>
    %272 = arith.addf %241, %262 : vector<4x1xf32>
    %273 = vector.extract_strided_slice %19 {offsets = [0, 5], sizes = [4, 1], strides = [1, 1]} : vector<4x8xf32> to vector<4x1xf32>
    %274 = vector.broadcast %273 : vector<4x1xf32> to vector<4x32xf32>
    %275 = vector.broadcast %109 : vector<1x32xf32> to vector<4x32xf32>
    %276 = arith.mulf %274, %275 : vector<4x32xf32>
    %277 = vector.broadcast %110 : vector<1x32xf32> to vector<4x32xf32>
    %278 = arith.addf %276, %277 : vector<4x32xf32>
    %cst_52 = arith.constant 0.000000e+00 : f32
    %279 = vector.broadcast %cst_52 : f32 to vector<4x32xf32>
    %280 = arith.maximumf %278, %279 : vector<4x32xf32>
    %281 = vector.broadcast %111 : vector<1x32xf32> to vector<4x32xf32>
    %282 = arith.mulf %280, %281 : vector<4x32xf32>
    %283 = vector.extract_strided_slice %282 {offsets = [0, 0], sizes = [4, 16], strides = [1, 1]} : vector<4x32xf32> to vector<4x16xf32>
    %cst_53 = arith.constant dense<0.000000e+00> : vector<4xf32>
    %284 = vector.multi_reduction <add>, %283, %cst_53 [1] : vector<4x16xf32> to vector<4xf32>
    %285 = vector.shape_cast %284 : vector<4xf32> to vector<4x1xf32>
    %286 = vector.broadcast %112 : vector<1x1xf32> to vector<4x1xf32>
    %287 = arith.addf %285, %286 : vector<4x1xf32>
    %288 = vector.extract_strided_slice %282 {offsets = [0, 16], sizes = [4, 16], strides = [1, 1]} : vector<4x32xf32> to vector<4x16xf32>
    %cst_54 = arith.constant dense<0.000000e+00> : vector<4xf32>
    %289 = vector.multi_reduction <add>, %288, %cst_54 [1] : vector<4x16xf32> to vector<4xf32>
    %290 = vector.shape_cast %289 : vector<4xf32> to vector<4x1xf32>
    %291 = vector.broadcast %113 : vector<1x1xf32> to vector<4x1xf32>
    %292 = arith.addf %290, %291 : vector<4x1xf32>
    %293 = math.tanh %292 : vector<4x1xf32>
    %cst_55 = arith.constant 0.000000e+00 : f32
    %294 = vector.broadcast %cst_55 : f32 to vector<4x1xf32>
    %295 = arith.subf %294, %293 : vector<4x1xf32>
    %296 = math.exp %295 : vector<4x1xf32>
    %297 = arith.mulf %287, %287 : vector<4x1xf32>
    %298 = arith.mulf %297, %296 : vector<4x1xf32>
    %299 = arith.addf %268, %298 : vector<4x1xf32>
    %300 = arith.mulf %287, %296 : vector<4x1xf32>
    %301 = arith.addf %270, %300 : vector<4x1xf32>
    %302 = arith.addf %271, %296 : vector<4x1xf32>
    %303 = arith.addf %272, %293 : vector<4x1xf32>
    %304 = vector.extract_strided_slice %19 {offsets = [0, 6], sizes = [4, 1], strides = [1, 1]} : vector<4x8xf32> to vector<4x1xf32>
    %305 = vector.broadcast %304 : vector<4x1xf32> to vector<4x32xf32>
    %306 = vector.broadcast %109 : vector<1x32xf32> to vector<4x32xf32>
    %307 = arith.mulf %305, %306 : vector<4x32xf32>
    %308 = vector.broadcast %110 : vector<1x32xf32> to vector<4x32xf32>
    %309 = arith.addf %307, %308 : vector<4x32xf32>
    %cst_56 = arith.constant 0.000000e+00 : f32
    %310 = vector.broadcast %cst_56 : f32 to vector<4x32xf32>
    %311 = arith.maximumf %309, %310 : vector<4x32xf32>
    %312 = vector.broadcast %111 : vector<1x32xf32> to vector<4x32xf32>
    %313 = arith.mulf %311, %312 : vector<4x32xf32>
    %314 = vector.extract_strided_slice %313 {offsets = [0, 0], sizes = [4, 16], strides = [1, 1]} : vector<4x32xf32> to vector<4x16xf32>
    %cst_57 = arith.constant dense<0.000000e+00> : vector<4xf32>
    %315 = vector.multi_reduction <add>, %314, %cst_57 [1] : vector<4x16xf32> to vector<4xf32>
    %316 = vector.shape_cast %315 : vector<4xf32> to vector<4x1xf32>
    %317 = vector.broadcast %112 : vector<1x1xf32> to vector<4x1xf32>
    %318 = arith.addf %316, %317 : vector<4x1xf32>
    %319 = vector.extract_strided_slice %313 {offsets = [0, 16], sizes = [4, 16], strides = [1, 1]} : vector<4x32xf32> to vector<4x16xf32>
    %cst_58 = arith.constant dense<0.000000e+00> : vector<4xf32>
    %320 = vector.multi_reduction <add>, %319, %cst_58 [1] : vector<4x16xf32> to vector<4xf32>
    %321 = vector.shape_cast %320 : vector<4xf32> to vector<4x1xf32>
    %322 = vector.broadcast %113 : vector<1x1xf32> to vector<4x1xf32>
    %323 = arith.addf %321, %322 : vector<4x1xf32>
    %324 = math.tanh %323 : vector<4x1xf32>
    %cst_59 = arith.constant 0.000000e+00 : f32
    %325 = vector.broadcast %cst_59 : f32 to vector<4x1xf32>
    %326 = arith.subf %325, %324 : vector<4x1xf32>
    %327 = math.exp %326 : vector<4x1xf32>
    %328 = arith.mulf %318, %318 : vector<4x1xf32>
    %329 = arith.mulf %328, %327 : vector<4x1xf32>
    %330 = arith.addf %299, %329 : vector<4x1xf32>
    %331 = arith.mulf %318, %327 : vector<4x1xf32>
    %332 = arith.addf %301, %331 : vector<4x1xf32>
    %333 = arith.addf %302, %327 : vector<4x1xf32>
    %334 = arith.addf %303, %324 : vector<4x1xf32>
    %cst_60 = arith.constant 2.000000e+00 : f32
    %335 = vector.broadcast %cst_60 : f32 to vector<4x1xf32>
    %336 = arith.mulf %335, %332 : vector<4x1xf32>
    %337 = vector.broadcast %336 : vector<4x1xf32> to vector<4x3xf32>
    %338 = arith.mulf %337, %1 : vector<4x3xf32>
    %339 = vector.broadcast %330 : vector<4x1xf32> to vector<4x3xf32>
    %340 = arith.subf %339, %338 : vector<4x3xf32>
    %341 = arith.mulf %1, %1 : vector<4x3xf32>
    %342 = vector.broadcast %333 : vector<4x1xf32> to vector<4x3xf32>
    %343 = arith.mulf %342, %341 : vector<4x3xf32>
    %344 = arith.addf %340, %343 : vector<4x3xf32>
    %345 = vector.broadcast %334 : vector<4x1xf32> to vector<4x3xf32>
    %346 = arith.addf %344, %345 : vector<4x3xf32>
    %cst_61 = arith.constant -5.000000e-01 : f32
    %347 = vector.broadcast %cst_61 : f32 to vector<4x3xf32>
    %348 = arith.mulf %347, %346 : vector<4x3xf32>
    %cst_62 = arith.constant dense<0.000000e+00> : vector<3xf32>
    %349 = vector.multi_reduction <add>, %348, %cst_62 [0] : vector<4x3xf32> to vector<3xf32>
    %350 = vector.shape_cast %349 : vector<3xf32> to vector<1x3xf32>
    %cst_63 = arith.constant 0.0357142873 : f32
    %351 = vector.broadcast %cst_63 : f32 to vector<1x3xf32>
    %352 = arith.mulf %350, %351 : vector<1x3xf32>
    %353 = arith.subf %108, %352 : vector<1x3xf32>
    %354 = math.absf %353 : vector<1x3xf32>
    %c0_64 = arith.constant 0 : index
    %c0_65 = arith.constant 0 : index
    %355 = vector.load %arg3[%c0_64, %c0_65] : memref<1x3xf32, #tpu.memory_space<vmem>>, vector<1x3xf32>
    tpu.vector_store %arg3[%c0_64, %c0_65], %354 {strides = array<i32>} : memref<1x3xf32, #tpu.memory_space<vmem>>, vector<1x3xf32>,
    return
  }
}

</mosaic_0001>

<bundles_post_ra>
// kernel: tpu_custom_call.1
= control target key start
LH: loop header
LB: loop body
LE: loop exit
PB: predicated region body
PF: predicated region fallthrough
CT: control target
= control target key end

     0   :  { %8 = vsyncpa [#allocation3], 0  ;;  %s847_s0 = inlined_call_operand.hbm [shape: f32[4,8], index: 0, kind: input, shape index: {}]   ;;  %s848_s1 = inlined_call_operand.hbm [shape: f32[4,3], index: 1, kind: input, shape index: {}]   ;;  %s849_s2 = inlined_call_operand.hbm [shape: f32[13,64], index: 2, kind: input, shape index: {}]   ;;  %s850_s3 = inlined_call_operand.hbm [shape: f32[1,3], index: 3, kind: output, shape index: {}]  }
   0x1   :  { %9 = vsyncpa [#allocation6], 0  ;;  %s27_s14 = sshll.u32 %s848_s1, 4  ;;  %s28_s14 = int_to_ptr.hbm [resolvable:$true] %s27_s14 }
   0x2   :  { %10 = vsyncpa [#allocation4], 0  ;;  %s697_s15 = smov [#allocation5]   ;;  %s16_s19 = sshll.u32 %s847_s0, 4  ;;  %s17_s19 = int_to_ptr.hbm [resolvable:$true] %s16_s19 }
   0x3   :  { %s29_s16 = sshll.u32 %s697_s15, 4  ;;  %s698_s20 = smov [#allocation2]   ;;  %s30_s16 = int_to_ptr.vmem [resolvable:$true] %s29_s16 }
   0x4   :  { %32 = dma.hbm_to_vmem [thread:$0]  %s28_s14, 64, %s30_s16, [#allocation6]  }
   0x5   :  { %s18_s21 = sshll.u32 %s698_s20, 4  ;;  %s37_s24 = sshll.u32 %s849_s2, 4  ;;  %s19_s21 = int_to_ptr.vmem [resolvable:$true] %s18_s21  ;;  %s38_s24 = int_to_ptr.hbm [resolvable:$true] %s37_s24 }
   0x6   :  { %21 = dma.hbm_to_vmem [thread:$0]  %s17_s19, 64, %s19_s21, [#allocation3]  }
   0x7   :  { %s699_s1 = smov [#allocation7]   ;;  %s700_s26 = smov 128  }
   0x8   :  { %s39_s25 = sshll.u32 %s699_s1, 4  ;;  %s701_s27 = smov 8   ;;  %s40_s25 = int_to_ptr.vmem [resolvable:$true] %s39_s25 }
   0x9   :  { %45 = dma.hbm_to_vmem [thread:$0]  %s38_s24, 256, %s40_s25, [#allocation6], %s700_s26, %s700_s26, %s701_s27  }
   0xa   :  { %691 = dma.done.wait [#allocation3], 64  }
   0xb   :  { %692 = vsyncadd [#allocation3], 4294967232 }
   0xc   :  { %693 = dma.done.wait [#allocation6], 320  }
   0xd   :  { %694 = vsyncadd [#allocation6], 4294966976  ;;  %vm65_vm0 = vcmask 64512   ;;  %vm96_vm1 = vcmask 60416   ;;  %v60_v0 = vld [vmem:[#allocation7] sm:$0xff]  ;;  %v702_v4 = vmov 2  }
   0xe   :  { %84 = vmatpush.msra.mxu0 %v60_v0  ;;  %v61_v1 = vld [vmem:[#allocation7 + $0x8] sm:$0x3]  ;;  %v58_v2 = vld [vmem:[#allocation2] sm:$0xf]  ;;  %545 = vset.pattern.permute.xlu1 %v702_v4  ;;  %v703_v5 = vmov 1   ;;  %v704_v6 = vmov 6  }
   0xf   :  { %524 = vmatmul.msk.f32.vlgmr.msra.gmra.mxu0 %vm65_vm0, %v61_v1  ;;  %v97_v3 = vsel %vm96_vm1, %v58_v2, 0.0  ;;  %544 = vset.pattern.permute.xlu2 %v703_v5  ;;  %v62_v9 = vld [vmem:[#allocation7 + $0xa] sm:$0x1]  ;;  %v705_v15 = vmov 3   ;;  %v706_v16 = vmov 0   ;;  %v707_v22 = vmov 5  }
  0x10   :  { %98 = vadd.xlane.f32.xlu0 %v97_v3  ;;  %v91_v10 = vrot.slane %v62_v9, 7  ;;  %v708_v23 = vmov 4   ;;  %v558_v25 = vld [vmem:[#allocation7 + $0xb] ss:$0 sm:$0xff]  ;;  %s709_s0 = smov 112   ;;  %vm118_vm2 = vcmask 125952  }
  0x11   :  { %542 = vset.pattern.permute.xlu0 %v704_v6  ;;  %s710_s2 = smov 96   ;;  %s711_s28 = smov 80   ;;  %vm200_vm4 = vcmask 19456   ;;  %vm504_vm5 = vcmask 16384  }
  0x12   :  { %s712_s29 = smov 127   ;;  %s713_s30 = smov [#allocation8]  }
  0x13   :  { %s511_s4 = sshll.u32 %s713_s30, 4  ;;  %s513_s7 = sshll.u32 %s850_s3, 4  ;;  %s512_s4 = int_to_ptr.vmem [resolvable:$true] %s511_s4  ;;  %s514_s7 = int_to_ptr.hbm [resolvable:$true] %s513_s7 }
  0x83   :  { %v99_v7 = vpop.xlane.xlu0 %98 }
  0x84   :  { %v100_v8 = vsub.f32 %v99_v7, %v58_v2 }
  0x86   :  { %286 = vperm.xlu1 %545, %v100_v8   ;;  %248 = vperm.xlu2 %544, %v100_v8  }
  0x87   :  { %110 = vperm.xlu0 %542, %v100_v8  }
  0x8c   :  { %v86_v11 = vpop.f32.mrf.mxu0 }
  0x8d   :  { %v89_v12 = vmul.f32 0.125, %v86_v11  ;;  %v94_v13 = vmul.f32 0.875, %v86_v11  ;;  %v93_v14 = vadd.f32 %v91_v10, %v86_v11 }
  0x8e   :  { %546 = vset.pattern.permute.xlu1 %v705_v15  ;;  %549 = vset.pattern.permute.xlu2 %v706_v16 }
  0x8f   :  { %v95_v17 = vadd.f32 %v94_v13, %v91_v10  ;;  %v746_v18 = vperm.slane %v89_v12, 0  ;;  %543 = vset.pattern.permute.xlu0 %v706_v16  ;;  %324 = vperm.xlu1 %546, %v100_v8   ;;  %v103_v20 = vperm.slane %v93_v14, 1  ;;  %v772_v16 = vld [vmem:[#allocation7 + $0xc] ss:$0 sm:$0xff] }
  0x90   :  { %210 = vperm.xlu0 %543, %v100_v8  }
  0x91   :  { %v102_v19 = vmul.f32 %v746_v18, %v99_v7  ;;  %v114_v29 = vperm.slane %v95_v17, 1 }
  0x93   :  { %v104_v21 = vadd.f32 %v103_v20, %v102_v19 }
  0x95   :  { %v105_v24 = vmax.f32 %v104_v21, 0.0 }
  0x97   :  { %548 = vset.pattern.permute.xlu1 %v707_v22  ;;  %v107_v26 = vmul.f32 %v558_v25, %v105_v24 }
  0x98   :  { %547 = vset.pattern.permute.xlu0 %v708_v23  ;;  %400 = vperm.xlu1 %548, %v100_v8  }
  0x99   :  { %362 = vperm.xlu0 %547, %v100_v8   ;;  %v119_v27 = vsel %vm118_vm2, %v107_v26, 0.0 }
  0xa0   :  { %125 = vrot.lane.b32.xlu1 %v107_v26, %s709_s0 }
  0xa1   :  { %555 = vset.pattern.permute.xlu1 %v705_v15  ;;  %551 = vset.pattern.permute.xlu0 %v703_v5 }
  0xca   :  { %120 = vadd.xlane.f32.xlu1 %v119_v27 }
  0xe0   :  { %v249_v28 = vpop.permute.xlu2 %248 }
  0xe1   :  { %v251_v30 = vmul.f32 %v249_v28, %v746_v18 }
  0xe3   :  { %v252_v31 = vadd.f32 %v251_v30, %v114_v29 }
  0xe5   :  { %v253_v32 = vmax.f32 %v252_v31, 0.0 }
  0xe7   :  { %v254_v33 = vmul.f32 %v558_v25, %v253_v32 }
  0xe9   :  { %256 = vrot.lane.b32.xlu1 %v254_v33, %s710_s2 }
  0xf8   :  { %v287_v34 = vpop.permute.xlu1 %286 }
  0xf9   :  { %v111_v35 = vpop.permute.xlu0 %110  ;;  %v289_v60 = vmul.f32 %v287_v34, %v746_v18 }
  0xfa   :  { %v113_v36 = vmul.f32 %v111_v35, %v746_v18 }
  0xfb   :  { %v290_v61 = vadd.f32 %v289_v60, %v114_v29 }
  0xfc   :  { %v115_v37 = vadd.f32 %v114_v29, %v113_v36 }
  0xfd   :  { %v291_v62 = vmax.f32 %v290_v61, 0.0 }
  0xfe   :  { %v116_v38 = vmax.f32 %v115_v37, 0.0 }
  0xff   :  { %v292_v63 = vmul.f32 %v558_v25, %v291_v62 }
 0x100   :  { %v117_v39 = vmul.f32 %v558_v25, %v116_v38 }
 0x101   :  { %v325_v40 = vpop.permute.xlu1 %324 }
 0x102   :  { %v327_v41 = vmul.f32 %v325_v40, %v746_v18  ;;  %138 = vrot.lane.b32.xlu2 %v117_v39, %s709_s0  ;;  %v211_v42 = vpop.permute.xlu0 %210  ;;  %v133_v3 = vsel %vm118_vm2, %v117_v39, 0.0 }
 0x103   :  { %v213_v43 = vmul.f32 %v211_v42, %v746_v18 }
 0x104   :  { %v328_v44 = vadd.f32 %v327_v41, %v114_v29 }
 0x105   :  { %v214_v45 = vadd.f32 %v213_v43, %v114_v29 }
 0x106   :  { %v329_v46 = vmax.f32 %v328_v44, 0.0 }
 0x107   :  { %v215_v47 = vmax.f32 %v214_v45, 0.0 }
 0x108   :  { %v330_v48 = vmul.f32 %v558_v25, %v329_v46 }
 0x109   :  { %v216_v49 = vmul.f32 %v558_v25, %v215_v47 }
 0x10a   :  { %v401_v50 = vpop.permute.xlu1 %400  ;;  %339 = vrot.lane.b32.xlu0 %v330_v48, %s711_s28 }
 0x10b   :  { %v403_v51 = vmul.f32 %v401_v50, %v746_v18  ;;  %218 = vrot.lane.b32.xlu2 %v216_v49, %s710_s2  ;;  %v363_v52 = vpop.permute.xlu0 %362 }
 0x10c   :  { %v365_v53 = vmul.f32 %v363_v52, %v746_v18 }
 0x10d   :  { %v404_v54 = vadd.f32 %v403_v51, %v114_v29 }
 0x10e   :  { %v366_v55 = vadd.f32 %v365_v53, %v114_v29 }
 0x10f   :  { %v405_v56 = vmax.f32 %v404_v54, 0.0 }
 0x110   :  { %v367_v57 = vmax.f32 %v366_v55, 0.0 }
 0x111   :  { %v406_v58 = vmul.f32 %v558_v25, %v405_v56 }
 0x112   :  { %v368_v59 = vmul.f32 %v558_v25, %v367_v57  ;;  %v126_v0 = vpop.permute.xlu1 %125 }
 0x113   :  { %225 = vrot.lane.b32.xlu2 %v216_v49, %s711_s28  ;;  %415 = vrot.lane.b32.xlu1 %v406_v58, %s711_s28  ;;  %v128_v9 = vsel %vm118_vm2, %v126_v0, 0.0 }
 0x114   :  { %377 = vrot.lane.b32.xlu0 %v368_v59, %s711_s28 }
 0x11b   :  { %263 = vrot.lane.b32.xlu2 %v254_v33, %s711_s28  ;;  %370 = vrot.lane.b32.xlu1 %v368_v59, %s710_s2 }
 0x11c   :  { %444 = vrot.lane.b32.xlu0 %v117_v39, %s711_s28 }
 0x123   :  { %294 = vrot.lane.b32.xlu2 %v292_v63, %s710_s2 }
 0x124   :  { %332 = vrot.lane.b32.xlu0 %v330_v48, %s710_s2 }
 0x12b   :  { %301 = vrot.lane.b32.xlu2 %v292_v63, %s711_s28 }
 0x12c   :  { %408 = vrot.lane.b32.xlu0 %v406_v58, %s710_s2 }
 0x133   :  { %437 = vrot.lane.b32.xlu2 %v117_v39, %s710_s2 }
 0x13d   :  { %v121_v1 = vpop.xlane.xlu1 %120 }
 0x13e   :  { %v123_v17 = vadd.f32 %v772_v16, %v121_v1 }
 0x15b   :  { %v257_v2 = vpop.permute.xlu1 %256 }
 0x15c   :  { %v139_v6 = vpop.permute.xlu2 %138  ;;  %134 = vadd.xlane.f32.xlu2 %v133_v3  ;;  %v259_v7 = vsel %vm118_vm2, %v257_v2, 0.0 }
 0x15d   :  { %v141_v8 = vsel %vm118_vm2, %v139_v6, 0.0  ;;  %260 = vadd.xlane.f32.xlu0 %v259_v7 }
 0x15e   :  { %142 = vadd.xlane.f32.xlu1 %v141_v8 }
 0x164   :  { %129 = vadd.xlane.f32.xlu2 %v128_v9 }
 0x165   :  { %v219_v10 = vpop.permute.xlu2 %218 }
 0x166   :  { %v221_v11 = vsel %vm118_vm2, %v219_v10, 0.0 }
 0x167   :  { %222 = vadd.xlane.f32.xlu1 %v221_v11 }
 0x16d   :  { %v226_v12 = vpop.permute.xlu2 %225 }
 0x16e   :  { %v228_v13 = vsel %vm118_vm2, %v226_v12, 0.0 }
 0x16f   :  { %229 = vadd.xlane.f32.xlu1 %v228_v13 }
 0x175   :  { %v264_v14 = vpop.permute.xlu2 %263 }
 0x176   :  { %v266_v26 = vsel %vm118_vm2, %v264_v14, 0.0 }
 0x17c   :  { %148 = vperm.xlu2 %549, %v123_v17   ;;  %v340_v18 = vpop.permute.xlu0 %339 }
 0x17d   :  { %v295_v19 = vpop.permute.xlu2 %294  ;;  %v342_v20 = vsel %vm118_vm2, %v340_v18, 0.0 }
 0x17e   :  { %v297_v21 = vsel %vm118_vm2, %v295_v19, 0.0  ;;  %343 = vadd.xlane.f32.xlu0 %v342_v20 }
 0x17f   :  { %298 = vadd.xlane.f32.xlu1 %v297_v21 }
 0x185   :  { %v302_v27 = vpop.permute.xlu2 %301  ;;  %v416_v30 = vpop.permute.xlu1 %415 }
 0x186   :  { %v378_v22 = vpop.permute.xlu0 %377  ;;  %v304_v28 = vsel %vm118_vm2, %v302_v27, 0.0  ;;  %v418_v31 = vsel %vm118_vm2, %v416_v30, 0.0 }
 0x187   :  { %v380_v29 = vsel %vm118_vm2, %v378_v22, 0.0 }
 0x18d   :  { %v371_v33 = vpop.permute.xlu1 %370  ;;  %v783_v34 = vpop.permute.xlu2 %437 }
 0x18e   :  { %v445_v23 = vpop.permute.xlu0 %444  ;;  %v373_v35 = vsel %vm118_vm2, %v371_v33, 0.0 }
 0x18f   :  { %v447_v32 = vsel %vm118_vm2, %v445_v23, 0.0 }
 0x196   :  { %v333_v24 = vpop.permute.xlu0 %332 }
 0x197   :  { %v335_v25 = vsel %vm118_vm2, %v333_v24, 0.0 }
 0x198   :  { %336 = vadd.xlane.f32.xlu1 %v335_v25 }
 0x19e   :  { %v789_v41 = vpop.permute.xlu0 %408 }
 0x1a5   :  { %267 = vadd.xlane.f32.xlu2 %v266_v26 }
 0x1ad   :  { %305 = vadd.xlane.f32.xlu2 %v304_v28 }
 0x1b5   :  { %381 = vadd.xlane.f32.xlu2 %v380_v29 }
 0x1bd   :  { %419 = vadd.xlane.f32.xlu2 %v418_v31 }
 0x1c5   :  { %448 = vadd.xlane.f32.xlu2 %v447_v32 }
 0x1cd   :  { %374 = vadd.xlane.f32.xlu2 %v373_v35 }
 0x1cf   :  { %v135_v37 = vpop.xlane.xlu2 %134 }
 0x1d0   :  { %v136_v43 = vadd.f32 %v772_v16, %v135_v37  ;;  %v796_v47 = vpop.xlane.xlu0 %260 }
 0x1d1   :  { %v143_v36 = vpop.xlane.xlu1 %142 }
 0x1d2   :  { %v144_v45 = vadd.f32 %v772_v16, %v143_v36 }
 0x1d7   :  { %v130_v39 = vpop.xlane.xlu2 %129 }
 0x1d8   :  { %v131_v40 = vadd.f32 %v772_v16, %v130_v39 }
 0x1da   :  { %v786_v38 = vpop.xlane.xlu1 %222  ;;  %559 = vtanh.f32 %v131_v40 }
 0x1df   :  { %v807_v60 = vpop.permute.xlu2 %148 }
 0x1e0   :  { %v794_v46 = vpop.eup %559 }
 0x1e1   :  { %v164_v50 = vmul.f32 0.5, %v794_v46 }
 0x1e2   :  { %v230_v42 = vpop.xlane.xlu1 %229 }
 0x1e3   :  { %v231_v44 = vadd.f32 %v772_v16, %v230_v42 }
 0x1e5   :  { %561 = vtanh.f32 %v231_v44  ;;  %173 = vperm.xlu2 %549, %v136_v43  }
 0x1e6   :  { %563 = vtanh.f32 %v144_v45  ;;  %v411_v45 = vsel %vm118_vm2, %v789_v41, 0.0 }
 0x1eb   :  { %v562_v48 = vpop.eup %561 }
 0x1ec   :  { %v233_v49 = vsub.f32 0.0, %v562_v48  ;;  %v800_v52 = vpop.eup %563 }
 0x1ed   :  { %550 = vset.pattern.permute.xlu2 %v703_v5  ;;  %v189_v55 = vmul.f32 0.5, %v800_v52 }
 0x1ee   :  { %v234_v51 = vmul.f32 1.442695, %v233_v49  ;;  %167 = vperm.xlu2 %550, %v164_v50   ;;  %v154_v49 = vsub.f32 0.0, %v794_v46 }
 0x1f0   :  { %565 = vpow2.f32 %v234_v51  ;;  %v155_v50 = vmul.f32 1.442695, %v154_v49  ;;  %v179_v51 = vsub.f32 0.0, %v800_v52  ;;  %v224_v52 = vadd.f32 %v772_v16, %v786_v38 }
 0x1f1   :  { %v344_v53 = vpop.xlane.xlu0 %343 }
 0x1f2   :  { %v345_v54 = vadd.f32 %v772_v16, %v344_v53  ;;  %v180_v53 = vmul.f32 1.442695, %v179_v51 }
 0x1f4   :  { %567 = vtanh.f32 %v345_v54 }
 0x1f6   :  { %v566_v56 = vpop.eup %565  ;;  %192 = vperm.xlu2 %550, %v189_v55  }
 0x1f7   :  { %238 = vrot.lane.b32.xlu0 %v566_v56, %s712_s29 }
 0x1fa   :  { %v568_v57 = vpop.eup %567 }
 0x1fb   :  { %v347_v58 = vsub.f32 0.0, %v568_v57 }
 0x1fd   :  { %v348_v59 = vmul.f32 1.442695, %v347_v58  ;;  %v262_v58 = vadd.f32 %v772_v16, %v796_v47 }
 0x1fe   :  { %553 = vset.pattern.permute.xlu2 %v702_v4 }
 0x1ff   :  { %569 = vpow2.f32 %v348_v59 }
 0x205   :  { %v570_v5 = vpop.eup %569 }
 0x206   :  { %352 = vrot.lane.b32.xlu2 %v570_v5, %s712_s29 }
 0x218   :  { %v268_v61 = vpop.xlane.xlu2 %267 }
 0x219   :  { %v269_v62 = vadd.f32 %v772_v16, %v268_v61  ;;  %v236_v61 = vmul.f32 %v224_v52, %v224_v52 }
 0x21b   :  { %571 = vtanh.f32 %v269_v62 }
 0x220   :  { %v306_v63 = vpop.xlane.xlu2 %305 }
 0x221   :  { %v572_v0 = vpop.eup %571  ;;  %v307_v1 = vadd.f32 %v772_v16, %v306_v63 }
 0x222   :  { %v271_v2 = vsub.f32 0.0, %v572_v0  ;;  %v284_v3 = vadd.f32 %v572_v0, %v562_v48  ;;  %v440_v48 = vsel %vm118_vm2, %v783_v34, 0.0  ;;  %v299_v34 = vpop.xlane.xlu1 %298 }
 0x223   :  { %573 = vtanh.f32 %v307_v1  ;;  %v300_v47 = vadd.f32 %v772_v16, %v299_v34  ;;  %v196_v34 = vlaneseq }
 0x224   :  { %v272_v6 = vmul.f32 1.442695, %v271_v2 }
 0x226   :  { %575 = vpow2.f32 %v272_v6 }
 0x228   :  { %v382_v7 = vpop.xlane.xlu2 %381 }
 0x229   :  { %v574_v8 = vpop.eup %573  ;;  %v383_v9 = vadd.f32 %v772_v16, %v382_v7 }
 0x22a   :  { %v309_v10 = vsub.f32 0.0, %v574_v8  ;;  %v322_v11 = vadd.f32 %v574_v8, %v284_v3  ;;  %v337_v46 = vpop.xlane.xlu1 %336 }
 0x22b   :  { %577 = vtanh.f32 %v383_v9 }
 0x22c   :  { %v576_v12 = vpop.eup %575  ;;  %v310_v13 = vmul.f32 1.442695, %v309_v10  ;;  %v360_v14 = vadd.f32 %v568_v57, %v322_v11 }
 0x22d   :  { %276 = vrot.lane.b32.xlu1 %v576_v12, %s712_s29  ;;  %v283_v17 = vadd.f32 %v576_v12, %v566_v56  ;;  %v312_v12 = vmul.f32 %v300_v47, %v300_v47 }
 0x22e   :  { %579 = vpow2.f32 %v310_v13  ;;  %v338_v13 = vadd.f32 %v772_v16, %v337_v46 }
 0x230   :  { %v420_v18 = vpop.xlane.xlu2 %419 }
 0x231   :  { %v578_v19 = vpop.eup %577  ;;  %v421_v20 = vadd.f32 %v772_v16, %v420_v18 }
 0x232   :  { %v385_v21 = vsub.f32 0.0, %v578_v19  ;;  %v398_v22 = vadd.f32 %v578_v19, %v360_v14 }
 0x233   :  { %581 = vtanh.f32 %v421_v20 }
 0x234   :  { %v580_v23 = vpop.eup %579  ;;  %v386_v24 = vmul.f32 1.442695, %v385_v21  ;;  %v350_v21 = vmul.f32 %v338_v13, %v338_v13 }
 0x235   :  { %314 = vrot.lane.b32.xlu0 %v580_v23, %s712_s29  ;;  %v321_v25 = vadd.f32 %v580_v23, %v283_v17 }
 0x236   :  { %583 = vpow2.f32 %v386_v24 }
 0x237   :  { %v359_v26 = vadd.f32 %v570_v5, %v321_v25  ;;  %v274_v5 = vmul.f32 %v262_v58, %v262_v58 }
 0x238   :  { %v449_v27 = vpop.xlane.xlu2 %448 }
 0x239   :  { %v582_v28 = vpop.eup %581  ;;  %v450_v29 = vadd.f32 %v772_v16, %v449_v27 }
 0x23a   :  { %v423_v30 = vsub.f32 0.0, %v582_v28  ;;  %v436_v31 = vadd.f32 %v582_v28, %v398_v22 }
 0x23b   :  { %585 = vtanh.f32 %v450_v29 }
 0x23c   :  { %v584_v32 = vpop.eup %583  ;;  %v424_v33 = vmul.f32 1.442695, %v423_v30 }
 0x23d   :  { %390 = vrot.lane.b32.xlu0 %v584_v32, %s712_s29  ;;  %v397_v35 = vadd.f32 %v584_v32, %v359_v26 }
 0x23e   :  { %587 = vpow2.f32 %v424_v33 }
 0x240   :  { %v375_v7 = vpop.xlane.xlu2 %374 }
 0x241   :  { %v586_v36 = vpop.eup %585  ;;  %v376_v17 = vadd.f32 %v772_v16, %v375_v7 }
 0x242   :  { %v452_v37 = vsub.f32 0.0, %v586_v36  ;;  %v465_v55 = vadd.f32 %v586_v36, %v436_v31 }
 0x243   :  { %v388_v23 = vmul.f32 %v376_v17, %v376_v17 }
 0x244   :  { %v588_v39 = vpop.eup %587  ;;  %v453_v40 = vmul.f32 1.442695, %v452_v37 }
 0x245   :  { %428 = vrot.lane.b32.xlu2 %v588_v39, %s712_s29  ;;  %v435_v42 = vadd.f32 %v588_v39, %v397_v35 }
 0x246   :  { %589 = vpow2.f32 %v453_v40 }
 0x247   :  { %591 = vpow2.f32 %v155_v50 }
 0x248   :  { %593 = vpow2.f32 %v180_v53 }
 0x24c   :  { %v590_v43 = vpop.eup %589 }
 0x24d   :  { %v818_v44 = vadd.f32 %v590_v43, %v435_v42  ;;  %v592_v54 = vpop.eup %591 }
 0x24e   :  { %v157_v56 = vmul.f32 0.5, %v592_v54  ;;  %v594_v41 = vpop.eup %593  ;;  %v59_v54 = vld [vmem:[#allocation5] sm:$0xf] }
 0x24f   :  { %v182_v57 = vmul.f32 0.5, %v594_v41 }
 0x257   :  { %412 = vadd.xlane.f32.xlu1 %v411_v45 }
 0x267   :  { %441 = vadd.xlane.f32.xlu0 %v440_v48 }
 0x269   :  { %v239_v59 = vpop.permute.xlu0 %238 }
 0x26a   :  { %v241_v63 = vmul.f32 %v239_v59, %v236_v61  ;;  %v243_v0 = vmul.f32 %v239_v59, %v224_v52  ;;  %v197_v52 = vand.u32 127, %v196_v34 }
 0x26c   :  { %vm198_vm3 = vcmp.eq.s32.totalorder %v197_v52, 0 }
 0x270   :  { %457 = vrot.lane.b32.xlu1 %v590_v43, %s712_s29 }
 0x278   :  { %489 = vperm.xlu1 %555, %v465_v55  }
 0x27b   :  { %160 = vperm.xlu0 %551, %v157_v56  }
 0x283   :  { %185 = vperm.xlu0 %551, %v182_v57  }
 0x28b   :  { %552 = vset.pattern.permute.xlu0 %v702_v4  ;;  %v174_v4 = vpop.permute.xlu2 %173 }
 0x28c   :  { %v176_v56 = vsub.f32 %v174_v4, %v59_v54 }
 0x28e   :  { %v177_v46 = vmul.f32 %v176_v56, %v176_v56 }
 0x290   :  { %v178_v59 = vsub.f32 0.0, %v177_v46 }
 0x293   :  { %v832_v8 = vpop.permute.xlu2 %167 }
 0x29b   :  { %v193_v10 = vpop.permute.xlu2 %192 }
 0x29f   :  { %v277_v62 = vpop.permute.xlu1 %276 }
 0x2a0   :  { %v279_v1 = vmul.f32 %v277_v62, %v274_v5  ;;  %v281_v2 = vmul.f32 %v277_v62, %v262_v58 }
 0x2a2   :  { %v280_v3 = vadd.f32 %v279_v1, %v241_v63  ;;  %v282_v6 = vadd.f32 %v281_v2, %v243_v0 }
 0x2a3   :  { %v353_v14 = vpop.permute.xlu2 %352 }
 0x2a4   :  { %v355_v27 = vmul.f32 %v353_v14, %v350_v21  ;;  %v357_v28 = vmul.f32 %v353_v14, %v338_v13 }
 0x2a7   :  { %v315_v9 = vpop.permute.xlu0 %314 }
 0x2a8   :  { %v317_v18 = vmul.f32 %v315_v9, %v312_v12  ;;  %v319_v19 = vmul.f32 %v315_v9, %v300_v47 }
 0x2aa   :  { %v318_v24 = vadd.f32 %v317_v18, %v280_v3  ;;  %v320_v25 = vadd.f32 %v319_v19, %v282_v6  ;;  %v479_v3 = vmul.f32 %v59_v54, %v59_v54 }
 0x2ab   :  { %v429_v32 = vpop.permute.xlu2 %428 }
 0x2ac   :  { %v356_v33 = vadd.f32 %v355_v27, %v318_v24  ;;  %v358_v35 = vadd.f32 %v357_v28, %v320_v25 }
 0x2af   :  { %v391_v11 = vpop.permute.xlu0 %390 }
 0x2b0   :  { %v393_v29 = vmul.f32 %v391_v11, %v388_v23  ;;  %v395_v30 = vmul.f32 %v391_v11, %v376_v17 }
 0x2b2   :  { %v394_v39 = vadd.f32 %v393_v29, %v356_v33  ;;  %v396_v40 = vadd.f32 %v395_v30, %v358_v35 }
 0x2ca   :  { %v413_v38 = vpop.xlane.xlu1 %412 }
 0x2cb   :  { %v414_v20 = vadd.f32 %v772_v16, %v413_v38 }
 0x2cd   :  { %v426_v26 = vmul.f32 %v414_v20, %v414_v20  ;;  %v433_v37 = vmul.f32 %v429_v32, %v414_v20 }
 0x2cf   :  { %v431_v36 = vmul.f32 %v429_v32, %v426_v26  ;;  %v434_v45 = vadd.f32 %v433_v37, %v396_v40 }
 0x2d1   :  { %v432_v48 = vadd.f32 %v431_v36, %v394_v39 }
 0x2da   :  { %v442_v22 = vpop.xlane.xlu0 %441 }
 0x2db   :  { %v443_v31 = vadd.f32 %v772_v16, %v442_v22  ;;  %v151_v16 = vsub.f32 %v807_v60, %v59_v54 }
 0x2dd   :  { %v455_v42 = vmul.f32 %v443_v31, %v443_v31  ;;  %v152_v57 = vmul.f32 %v151_v16, %v151_v16 }
 0x2df   :  { %v153_v58 = vsub.f32 0.0, %v152_v57 }
 0x2e2   :  { %v458_v43 = vpop.permute.xlu1 %457 }
 0x2e3   :  { %v460_v49 = vmul.f32 %v458_v43, %v455_v42  ;;  %v462_v50 = vmul.f32 %v458_v43, %v443_v31 }
 0x2e5   :  { %v461_v51 = vadd.f32 %v460_v49, %v432_v48  ;;  %v463_v53 = vadd.f32 %v462_v50, %v434_v45 }
 0x2e7   :  { %475 = vperm.xlu2 %553, %v461_v51   ;;  %v466_v55 = vmul.f32 2.0, %v463_v53 }
 0x2e9   :  { %469 = vperm.xlu0 %552, %v466_v55  }
 0x2ea   :  { %v490_v38 = vpop.permute.xlu1 %489 }
 0x2ed   :  { %v161_v41 = vpop.permute.xlu0 %160 }
 0x2ee   :  { %v163_v5 = vmul.f32 %v161_v41, %v153_v58 }
 0x2ef   :  { %554 = vset.pattern.permute.xlu2 %v705_v15 }
 0x2f0   :  { %482 = vperm.xlu2 %554, %v818_v44   ;;  %v170_v60 = vsub.f32 %v163_v5, %v832_v8 }
 0x2f1   :  { %556 = vset.pattern.permute.xlu0 %v705_v15 }
 0x2f5   :  { %v186_v61 = vpop.permute.xlu0 %185 }
 0x2f6   :  { %v188_v62 = vmul.f32 %v186_v61, %v178_v59 }
 0x2f8   :  { %v195_v63 = vsub.f32 %v188_v62, %v193_v10 }
 0x2fa   :  { %v199_v0 = vsel %vm198_vm3, %v170_v60, %v195_v63 }
 0x2fb   :  { %v201_v2 = vsel %vm200_vm4, %v199_v0, 0.0 }
 0x2fc   :  { %v202_v6 = vrot.slane %v201_v2, 4 }
 0x2fe   :  { %v203_v47 = vadd.f32 %v202_v6, %v201_v2 }
 0x300   :  { %v204_v13 = vrot.slane %v203_v47, 2 }
 0x302   :  { %v205_v8 = vadd.f32 %v204_v13, %v203_v47 }
 0x304   :  { %v206_v20 = vrot.slane %v205_v8, 1 }
 0x306   :  { %v207_v22 = vadd.f32 %v206_v20, %v205_v8 }
 0x308   :  { %v208_v25 = vmul.f32 0.25, %v207_v22 }
 0x341   :  { %v476_v1 = vpop.permute.xlu2 %475 }
 0x34a   :  { %v483_v7 = vpop.permute.xlu2 %482 }
 0x34b   :  { %v485_v15 = vmul.f32 %v483_v7, %v479_v3 }
 0x35b   :  { %v470_v44 = vpop.permute.xlu0 %469 }
 0x35c   :  { %v472_v4 = vmul.f32 %v470_v44, %v59_v54 }
 0x35e   :  { %v478_v9 = vsub.f32 %v476_v1, %v472_v4 }
 0x360   :  { %v486_v11 = vadd.f32 %v485_v15, %v478_v9 }
 0x362   :  { %v492_v12 = vadd.f32 %v490_v38, %v486_v11 }
 0x364   :  { %v493_v14 = vmul.f32 -0.5, %v492_v12 }
 0x366   :  { %v494_v17 = vsel %vm200_vm4, %v493_v14, 0.0 }
 0x367   :  { %v495_v10 = vrot.slane %v494_v17, 4 }
 0x369   :  { %v496_v18 = vadd.f32 %v495_v10, %v494_v17 }
 0x36b   :  { %v497_v19 = vrot.slane %v496_v18, 2 }
 0x36d   :  { %v498_v21 = vadd.f32 %v497_v19, %v496_v18 }
 0x36f   :  { %v499_v23 = vrot.slane %v498_v21, 1 }
 0x371   :  { %v500_v24 = vadd.f32 %v499_v23, %v498_v21 }
 0x373   :  { %v501_v26 = vmul.f32 0.035714287, %v500_v24 }
 0x375   :  { %v502_v27 = vsub.f32 %v208_v25, %v501_v26 }
 0x377   :  { %v503_v28 = vand.u32 2147483647, %v502_v27 }
 0x379   :  { %505 = vst.msk [vmem:[#allocation8] sm:$0x1] %vm504_vm5, %v503_v28 }
 0x37a   :  { %516 = dma.vmem_to_hbm [thread:$0]  %s512_s4, 16, %s514_s7, [#allocation4]  }
 0x37b   :  { %695 = dma.done.wait [#allocation4], 16  }
 0x37c   :  { %696 = vsyncadd [#allocation4], 4294967280 }
 0x37d   :  { %521 = vsyncpa [#allocation3], 1 }
 0x37e   :  { %522 = vsyncpa [#allocation6], 1 }
 0x37f   :  { %523 = vsyncpa [#allocation4], 1 }

</bundles_post_ra>
